<compile_context>
chip_gen: v7x
topology: tpu7x:2x2x1
jax: 0.10.0
libtpu: 0.0.40
codegen_flags: <defaults>
</compile_context>

<pallas_src>
import math

import jax
import jax.numpy as jnp
from jax.experimental import pallas as pl
from jax.experimental.pallas import tpu as pltpu

# ----------------------------- model dimensions ------------------------------
B = 16                         # example batch (>=8 per perf feedback)
C_IN = 4                       # input channels
H = W = 8                      # input spatial
K_ENC = 4                      # encoder conv kernel == stride -> 2x2 output
C_ECONV = 100                  # encoder conv output channels (forced by [100,2,2])
OH = OW = H // K_ENC           # 2
N_PATCH = OH * OW              # 4 non-overlapping patches
FLAT = C_ECONV * N_PATCH       # 400
E_DENSE = 32                   # encoder dense width
Z_DIM = 16                     # latent dim
K_DEC = 4                      # decoder "transposed conv" kernel == stride
PATCH_IN = C_IN * K_ENC * K_ENC    # 64  elements per input patch
PATCH_OUT = C_IN * K_DEC * K_DEC   # 64  elements per output patch
IN_FLAT = N_PATCH * PATCH_IN       # 256 (patch-major im2col'd input)
OUT_FLAT = N_PATCH * PATCH_OUT     # 256 (patch-major reconstruction)
XE_W = IN_FLAT + Z_DIM             # 272 (input slab: x patches || eps)
OUT_W = 384                        # 3*128 lanes (recon || mu|logvar || z || pad)
OUT_PAD = OUT_W - OUT_FLAT - 3 * Z_DIM   # 80
TB = 8                             # samples per grid step (f32 sublane tile)


# ------------------------------ fused Pallas kernel ---------------------------
def _fused_vae_kernel(xe_ref, wec_ref, wed_ref, wmv_ref, wz_ref, wdd_ref,
                      wdc_ref, b_ref, out_ref):
    f32 = jnp.float32
    bf16 = jnp.bfloat16

    def mm(a, w):
        # bf16 operands, f32 accumulation (== default-precision f32 MXU path).
        return jnp.dot(a.astype(bf16), w, preferred_element_type=f32)

    xe = xe_ref[...]                                   # (TB, 272) f32
    eps = xe[:, IN_FLAT:IN_FLAT + Z_DIM]               # (TB, 16)

    # packed bias slab (one DMA): rows = [b_econv, b_edense, b_muvar, b_z,
    #                                     b_ddense(perm), b_dconv, 0, 0]
    bec = b_ref[0:1, :C_ECONV]                         # (1, 100)
    bed = b_ref[1:2, :E_DENSE]                         # (1, 32)
    bmv = b_ref[2:3, :2 * Z_DIM]                       # (1, 32)
    bz = b_ref[3:4, :E_DENSE]                          # (1, 32)
    bdc = b_ref[5:6, :PATCH_OUT]                       # (1, 64)

    wec = wec_ref[...]                                 # (64, 100)  bf16
    wmv = wmv_ref[...]                                 # (32, 32)   bf16
    wzw = wz_ref[...]                                  # (16, 32)   bf16
    wdc = wdc_ref[...]                                 # (100, 64)  bf16

    # ---- encoder: stride==kernel conv as 4 per-patch dots (+ ReLU), with the
    # ---- encoder-dense contraction accumulated patch-by-patch ----------------
    econv = []                                         # 4 x (TB, 100)
    ed_acc = jnp.zeros((TB, E_DENSE), f32)
    for s in range(N_PATCH):
        xs = xe[:, s * PATCH_IN:(s + 1) * PATCH_IN]    # (TB, 64)
        ec = jnp.maximum(mm(xs, wec) + bec, 0.0)       # (TB, 100)
        econv.append(ec)
        ed_acc = ed_acc + mm(ec, wed_ref[s])           # (100, 32) slice, resident
    edense = jnp.maximum(ed_acc + bed, 0.0)            # (TB, 32)

    # ---- bottleneck: fused mu|logvar, reparameterization (eps ~ U[0,1)) -----
    muvar = mm(edense, wmv) + bmv                      # (TB, 32)
    mu = muvar[:, :Z_DIM]
    logvar = muvar[:, Z_DIM:]
    z = mu + jnp.exp(0.5 * logvar) * eps               # (TB, 16)

    # ---- decoder ------------------------------------------------------------
    zc = jnp.maximum(mm(z, wzw) + bz, 0.0)             # (TB, 32)
    h = zc + edense                                    # skip: Z + eDense

    for s in range(N_PATCH):
        bdd_s = b_ref[4:5, s * C_ECONV:(s + 1) * C_ECONV]            # (1, 100)
        dds = jnp.maximum(mm(h, wdd_ref[s]) + bdd_s, 0.0)            # (TB, 100)
        rp = jax.nn.sigmoid(mm(dds + econv[s], wdc) + bdc)           # (TB, 64)
        out_ref[:, s * PATCH_OUT:(s + 1) * PATCH_OUT] = rp

    # pack aux outputs into the same lane-dense slab
    out_ref[:, OUT_FLAT:OUT_FLAT + 2 * Z_DIM] = muvar
    out_ref[:, OUT_FLAT + 2 * Z_DIM:OUT_FLAT + 3 * Z_DIM] = z
    out_ref[:, OUT_FLAT + 3 * Z_DIM:] = jnp.zeros((TB, OUT_PAD), f32)


# ------------------------ parameter init + layout folding ---------------------
def init_params(key):
    ks = jax.random.split(key, 14)

    def uni(k, shape, bound):
        return jax.random.uniform(k, shape, jnp.float32, -bound, bound)

    # encoder conv Conv2d(4, 100, k=4, s=4); compact weight, rows = c*16+kh*4+kw
    bnd_ec = 1.0 / math.sqrt(C_IN * K_ENC * K_ENC)
    w_ec = uni(ks[0], (PATCH_IN, C_ECONV), bnd_ec)
    b_ec = uni(ks[1], (C_ECONV,), bnd_ec)
    # encoder dense Linear(400, 32); rows in PyTorch NCHW-flatten order [c*4+s]
    bnd_ed = 1.0 / math.sqrt(FLAT)
    w_ed = uni(ks[2], (FLAT, E_DENSE), bnd_ed)
    b_ed = uni(ks[3], (E_DENSE,), bnd_ed)
    # mu_, var_ Linear(32, 16)
    bnd_mv = 1.0 / math.sqrt(E_DENSE)
    w_mu = uni(ks[4], (E_DENSE, Z_DIM), bnd_mv)
    b_mu = uni(ks[5], (Z_DIM,), bnd_mv)
    w_vr = uni(ks[6], (E_DENSE, Z_DIM), bnd_mv)
    b_vr = uni(ks[7], (Z_DIM,), bnd_mv)
    # z_ Linear(16, 32)
    bnd_z = 1.0 / math.sqrt(Z_DIM)
    w_z = uni(ks[8], (Z_DIM, E_DENSE), bnd_z)
    b_z = uni(ks[9], (E_DENSE,), bnd_z)
    # decoder dense Linear(32, 400); cols in NCHW order [c*4+s]
    w_dd = uni(ks[10], (E_DENSE, FLAT), bnd_mv)
    b_dd = uni(ks[11], (FLAT,), bnd_mv)
    # decoder conv ConvTranspose2d(100, 4, k=4, s=4); compact, cols = c*16+kh*4+kw
    bnd_dc = 1.0 / math.sqrt(C_IN * K_DEC * K_DEC)
    w_dc = uni(ks[12], (C_ECONV, PATCH_OUT), bnd_dc)
    b_dc = uni(ks[13], (C_IN,), bnd_dc)

    # --- fold the NCHW-flatten permutations into patch-blocked 3-D weights ----
    wed3 = w_ed.reshape(C_ECONV, N_PATCH, E_DENSE).transpose(1, 0, 2)   # (4,100,32)
    wdd3 = w_dd.reshape(E_DENSE, C_ECONV, N_PATCH).transpose(2, 0, 1)   # (4,32,100)
    wmv = jnp.concatenate([w_mu, w_vr], axis=1)                         # (32, 32)
    bmv = jnp.concatenate([b_mu, b_vr], axis=0)                         # (32,)
    bdd_perm = b_dd.reshape(C_ECONV, N_PATCH).transpose(1, 0).reshape(FLAT)
    bdc_patch = jnp.repeat(b_dc, K_DEC * K_DEC)                         # (64,)

    # --- pack all biases into one (8, 400) f32 slab (single DMA) --------------
    biases = jnp.zeros((8, FLAT), jnp.float32)
    biases = biases.at[0, :C_ECONV].set(b_ec)
    biases = biases.at[1, :E_DENSE].set(b_ed)
    biases = biases.at[2, :2 * Z_DIM].set(bmv)
    biases = biases.at[3, :E_DENSE].set(b_z)
    biases = biases.at[4, :FLAT].set(bdd_perm)
    biases = biases.at[5, :PATCH_OUT].set(bdc_patch)

    bf = jnp.bfloat16
    return {
        "wec": w_ec.astype(bf), "wed": wed3.astype(bf), "wmv": wmv.astype(bf),
        "wz": w_z.astype(bf), "wdd": wdd3.astype(bf), "wdc": w_dc.astype(bf),
        "biases": biases,
    }


# ------------------------------ forward wrapper --------------------------------
def bezier_vae_forward(params, x, eps):
    b = x.shape[0]
    # Tiny host-side im2col (stride==kernel, non-overlapping): (B,C,H,W) ->
    # (B, 256) with lane index s*64 + c*16 + kh*4 + kw, s = oh*OW + ow.
    xp = (x.reshape(b, C_IN, OH, K_ENC, OW, K_ENC)
           .transpose(0, 2, 4, 1, 3, 5).reshape(b, IN_FLAT))
    xe = jnp.concatenate([xp, eps.astype(jnp.float32)], axis=1)         # (B, 272)

    # pad batch to a multiple of the 8-row sublane tile / grid block
    bp = ((b + TB - 1) // TB) * TB
    if bp != b:
        xe = jnp.pad(xe, ((0, bp - b), (0, 0)))
    grid = (bp // TB,)

    flops = 2 * bp * (N_PATCH * PATCH_IN * C_ECONV + FLAT * E_DENSE
                      + E_DENSE * 2 * Z_DIM + Z_DIM * E_DENSE
                      + E_DENSE * FLAT + N_PATCH * C_ECONV * PATCH_OUT)
    transcendentals = bp * (Z_DIM + OUT_FLAT)
    wbytes = 2 * sum(int(params[k].size)
                     for k in ("wec", "wed", "wmv", "wz", "wdd", "wdc"))
    bytes_accessed = 4 * (int(xe.size) + bp * OUT_W + int(params["biases"].size)) + wbytes
    cost = pl.CostEstimate(flops=flops, transcendentals=transcendentals,
                           bytes_accessed=bytes_accessed)

    const2 = lambda i: (0, 0)
    const3 = lambda i: (0, 0, 0)
    out = pl.pallas_call(
        _fused_vae_kernel,
        out_shape=jax.ShapeDtypeStruct((bp, OUT_W), jnp.float32),
        grid=grid,
        in_specs=[
            pl.BlockSpec((TB, XE_W), lambda i: (i, 0)),                 # x || eps
            pl.BlockSpec((PATCH_IN, C_ECONV), const2),                  # wec (resident)
            pl.BlockSpec((N_PATCH, C_ECONV, E_DENSE), const3),          # wed (resident)
            pl.BlockSpec((E_DENSE, 2 * Z_DIM), const2),                 # wmv (resident)
            pl.BlockSpec((Z_DIM, E_DENSE), const2),                     # wz  (resident)
            pl.BlockSpec((N_PATCH, E_DENSE, C_ECONV), const3),          # wdd (resident)
            pl.BlockSpec((C_ECONV, PATCH_OUT), const2),                 # wdc (resident)
            pl.BlockSpec((8, FLAT), const2),                            # bias slab
        ],
        out_specs=pl.BlockSpec((TB, OUT_W), lambda i: (i, 0)),
        compiler_params=pltpu.CompilerParams(
            dimension_semantics=("parallel",)),
        cost_estimate=cost,
    )(xe, params["wec"], params["wed"], params["wmv"], params["wz"],
      params["wdd"], params["wdc"], params["biases"])

    out = out[:b]
    recon_p = out[:, :OUT_FLAT]
    muvar = out[:, OUT_FLAT:OUT_FLAT + 2 * Z_DIM]
    z = out[:, OUT_FLAT + 2 * Z_DIM:OUT_FLAT + 3 * Z_DIM]
    mu = muvar[:, :Z_DIM]
    logvar = muvar[:, Z_DIM:]
    # tiny col2im back to NCHW (inverse of the wrapper im2col)
    recon = (recon_p.reshape(b, OH, OW, C_IN, K_DEC, K_DEC)
                     .transpose(0, 3, 1, 4, 2, 5).reshape(b, C_IN, H, W))
    return recon, z, mu, logvar


# ----------------------------------- main --------------------------------------
if __name__ == "__main__":
    key = jax.random.PRNGKey(0)
    k_param, k_x, k_eps = jax.random.split(key, 3)

    params = init_params(k_param)
    x = jax.random.uniform(k_x, (B, C_IN, H, W), jnp.float32)     # inputs in [0,1)
    eps = jax.random.uniform(k_eps, (B, Z_DIM), jnp.float32)      # torch.rand_like

    fwd = jax.jit(bezier_vae_forward)
    recon, z, mu, logvar = fwd(params, x, eps)
    jax.block_until_ready((recon, z, mu, logvar))

    assert recon.shape == (B, C_IN, H, W)
    assert z.shape == (B, Z_DIM) and mu.shape == (B, Z_DIM) and logvar.shape == (B, Z_DIM)
    assert bool(jnp.all((recon >= 0.0) & (recon <= 1.0)))
    assert bool(jnp.all(jnp.isfinite(recon))) and bool(jnp.all(jnp.isfinite(z)))
    print("KERNEL_OK")
</pallas_src>

<mosaic_0001>
module attributes {stable_mosaic.version = 11 : i64} {
  func.func @_fused_vae_kernel(%arg0: i32, %arg1: memref<8x272xf32, #tpu.memory_space<vmem>>, %arg2: memref<64x100xbf16, #tpu.memory_space<vmem>>, %arg3: memref<4x100x32xbf16, #tpu.memory_space<vmem>>, %arg4: memref<32x32xbf16, #tpu.memory_space<vmem>>, %arg5: memref<16x32xbf16, #tpu.memory_space<vmem>>, %arg6: memref<4x32x100xbf16, #tpu.memory_space<vmem>>, %arg7: memref<100x64xbf16, #tpu.memory_space<vmem>>, %arg8: memref<8x400xf32, #tpu.memory_space<vmem>>, %arg9: memref<8x384xf32, #tpu.memory_space<vmem>>) attributes {dimension_semantics = [#tpu.dimension_semantics<parallel>], iteration_bounds = array<i64: 2>, scalar_prefetch = 0 : i64, scratch_operands = 0 : i64, tpu.core_type = #tpu.core_type<tc>, window_params = [{transform_indices = @transform_0, window_bounds = array<i64: 8, 272>}, {pipeline_mode = #tpu.pipeline_mode<synchronous>, transform_indices = @transform_1, window_bounds = array<i64: 64, 100>}, {pipeline_mode = #tpu.pipeline_mode<synchronous>, transform_indices = @transform_2, window_bounds = array<i64: 4, 100, 32>}, {pipeline_mode = #tpu.pipeline_mode<synchronous>, transform_indices = @transform_3, window_bounds = array<i64: 32, 32>}, {pipeline_mode = #tpu.pipeline_mode<synchronous>, transform_indices = @transform_4, window_bounds = array<i64: 16, 32>}, {pipeline_mode = #tpu.pipeline_mode<synchronous>, transform_indices = @transform_5, window_bounds = array<i64: 4, 32, 100>}, {pipeline_mode = #tpu.pipeline_mode<synchronous>, transform_indices = @transform_6, window_bounds = array<i64: 100, 64>}, {pipeline_mode = #tpu.pipeline_mode<synchronous>, transform_indices = @transform_7, window_bounds = array<i64: 8, 400>}, {transform_indices = @transform_8, window_bounds = array<i64: 8, 384>}]} {
    %c0 = arith.constant 0 : index
    %c0_0 = arith.constant 0 : index
    %0 = vector.load %arg1[%c0, %c0_0] : memref<8x272xf32, #tpu.memory_space<vmem>>, vector<8x272xf32>
    %1 = vector.extract_strided_slice %0 {offsets = [0, 256], sizes = [8, 16], strides = [1, 1]} : vector<8x272xf32> to vector<8x16xf32>
    %c0_1 = arith.constant 0 : index
    %c0_2 = arith.constant 0 : index
    %2 = vector.load %arg8[%c0_1, %c0_2] : memref<8x400xf32, #tpu.memory_space<vmem>>, vector<1x100xf32>
    %c1 = arith.constant 1 : index
    %c0_3 = arith.constant 0 : index
    %3 = vector.load %arg8[%c1, %c0_3] : memref<8x400xf32, #tpu.memory_space<vmem>>, vector<1x32xf32>
    %c2 = arith.constant 2 : index
    %c0_4 = arith.constant 0 : index
    %4 = vector.load %arg8[%c2, %c0_4] : memref<8x400xf32, #tpu.memory_space<vmem>>, vector<1x32xf32>
    %c3 = arith.constant 3 : index
    %c0_5 = arith.constant 0 : index
    %5 = vector.load %arg8[%c3, %c0_5] : memref<8x400xf32, #tpu.memory_space<vmem>>, vector<1x32xf32>
    %c5 = arith.constant 5 : index
    %c0_6 = arith.constant 0 : index
    %6 = vector.load %arg8[%c5, %c0_6] : memref<8x400xf32, #tpu.memory_space<vmem>>, vector<1x64xf32>
    %c0_7 = arith.constant 0 : index
    %c0_8 = arith.constant 0 : index
    %7 = vector.load %arg2[%c0_7, %c0_8] : memref<64x100xbf16, #tpu.memory_space<vmem>>, vector<64x100xbf16>
    %c0_9 = arith.constant 0 : index
    %c0_10 = arith.constant 0 : index
    %8 = vector.load %arg4[%c0_9, %c0_10] : memref<32x32xbf16, #tpu.memory_space<vmem>>, vector<32x32xbf16>
    %c0_11 = arith.constant 0 : index
    %c0_12 = arith.constant 0 : index
    %9 = vector.load %arg5[%c0_11, %c0_12] : memref<16x32xbf16, #tpu.memory_space<vmem>>, vector<16x32xbf16>
    %c0_13 = arith.constant 0 : index
    %c0_14 = arith.constant 0 : index
    %10 = vector.load %arg7[%c0_13, %c0_14] : memref<100x64xbf16, #tpu.memory_space<vmem>>, vector<100x64xbf16>
    %cst = arith.constant 0.000000e+00 : f32
    %11 = vector.broadcast %cst : f32 to vector<8x32xf32>
    %12 = vector.extract_strided_slice %0 {offsets = [0, 0], sizes = [8, 64], strides = [1, 1]} : vector<8x272xf32> to vector<8x64xf32>
    %13 = arith.truncf %12 : vector<8x64xf32> to vector<8x64xbf16>
    %cst_15 = arith.constant dense<0.000000e+00> : vector<8x100xf32>
    %14 = tpu.matmul %13, %7, %cst_15 {dimension_numbers = #tpu.dot_dimension_numbers<[1], [0], [0], [1], [0, 0, 1, 1], [], []>} : vector<8x64xbf16>, vector<64x100xbf16>, vector<8x100xf32> -> vector<8x100xf32>
    %15 = vector.broadcast %2 : vector<1x100xf32> to vector<8x100xf32>
    %16 = arith.addf %14, %15 : vector<8x100xf32>
    %cst_16 = arith.constant 0.000000e+00 : f32
    %17 = vector.broadcast %cst_16 : f32 to vector<8x100xf32>
    %18 = arith.maximumf %16, %17 : vector<8x100xf32>
    %c0_17 = arith.constant 0 : index
    %c0_18 = arith.constant 0 : index
    %c0_19 = arith.constant 0 : index
    %19 = vector.load %arg3[%c0_17, %c0_18, %c0_19] : memref<4x100x32xbf16, #tpu.memory_space<vmem>>, vector<1x100x32xbf16>
    %20 = vector.shape_cast %19 : vector<1x100x32xbf16> to vector<100x32xbf16>
    %21 = arith.truncf %18 : vector<8x100xf32> to vector<8x100xbf16>
    %cst_20 = arith.constant dense<0.000000e+00> : vector<8x32xf32>
    %22 = tpu.matmul %21, %20, %cst_20 {dimension_numbers = #tpu.dot_dimension_numbers<[1], [0], [0], [1], [0, 0, 1, 1], [], []>} : vector<8x100xbf16>, vector<100x32xbf16>, vector<8x32xf32> -> vector<8x32xf32>
    %23 = arith.addf %11, %22 : vector<8x32xf32>
    %24 = vector.extract_strided_slice %0 {offsets = [0, 64], sizes = [8, 64], strides = [1, 1]} : vector<8x272xf32> to vector<8x64xf32>
    %25 = arith.truncf %24 : vector<8x64xf32> to vector<8x64xbf16>
    %cst_21 = arith.constant dense<0.000000e+00> : vector<8x100xf32>
    %26 = tpu.matmul %25, %7, %cst_21 {dimension_numbers = #tpu.dot_dimension_numbers<[1], [0], [0], [1], [0, 0, 1, 1], [], []>} : vector<8x64xbf16>, vector<64x100xbf16>, vector<8x100xf32> -> vector<8x100xf32>
    %27 = vector.broadcast %2 : vector<1x100xf32> to vector<8x100xf32>
    %28 = arith.addf %26, %27 : vector<8x100xf32>
    %cst_22 = arith.constant 0.000000e+00 : f32
    %29 = vector.broadcast %cst_22 : f32 to vector<8x100xf32>
    %30 = arith.maximumf %28, %29 : vector<8x100xf32>
    %c1_23 = arith.constant 1 : index
    %c0_24 = arith.constant 0 : index
    %c0_25 = arith.constant 0 : index
    %31 = vector.load %arg3[%c1_23, %c0_24, %c0_25] : memref<4x100x32xbf16, #tpu.memory_space<vmem>>, vector<1x100x32xbf16>
    %32 = vector.shape_cast %31 : vector<1x100x32xbf16> to vector<100x32xbf16>
    %33 = arith.truncf %30 : vector<8x100xf32> to vector<8x100xbf16>
    %cst_26 = arith.constant dense<0.000000e+00> : vector<8x32xf32>
    %34 = tpu.matmul %33, %32, %cst_26 {dimension_numbers = #tpu.dot_dimension_numbers<[1], [0], [0], [1], [0, 0, 1, 1], [], []>} : vector<8x100xbf16>, vector<100x32xbf16>, vector<8x32xf32> -> vector<8x32xf32>
    %35 = arith.addf %23, %34 : vector<8x32xf32>
    %36 = vector.extract_strided_slice %0 {offsets = [0, 128], sizes = [8, 64], strides = [1, 1]} : vector<8x272xf32> to vector<8x64xf32>
    %37 = arith.truncf %36 : vector<8x64xf32> to vector<8x64xbf16>
    %cst_27 = arith.constant dense<0.000000e+00> : vector<8x100xf32>
    %38 = tpu.matmul %37, %7, %cst_27 {dimension_numbers = #tpu.dot_dimension_numbers<[1], [0], [0], [1], [0, 0, 1, 1], [], []>} : vector<8x64xbf16>, vector<64x100xbf16>, vector<8x100xf32> -> vector<8x100xf32>
    %39 = vector.broadcast %2 : vector<1x100xf32> to vector<8x100xf32>
    %40 = arith.addf %38, %39 : vector<8x100xf32>
    %cst_28 = arith.constant 0.000000e+00 : f32
    %41 = vector.broadcast %cst_28 : f32 to vector<8x100xf32>
    %42 = arith.maximumf %40, %41 : vector<8x100xf32>
    %c2_29 = arith.constant 2 : index
    %c0_30 = arith.constant 0 : index
    %c0_31 = arith.constant 0 : index
    %43 = vector.load %arg3[%c2_29, %c0_30, %c0_31] : memref<4x100x32xbf16, #tpu.memory_space<vmem>>, vector<1x100x32xbf16>
    %44 = vector.shape_cast %43 : vector<1x100x32xbf16> to vector<100x32xbf16>
    %45 = arith.truncf %42 : vector<8x100xf32> to vector<8x100xbf16>
    %cst_32 = arith.constant dense<0.000000e+00> : vector<8x32xf32>
    %46 = tpu.matmul %45, %44, %cst_32 {dimension_numbers = #tpu.dot_dimension_numbers<[1], [0], [0], [1], [0, 0, 1, 1], [], []>} : vector<8x100xbf16>, vector<100x32xbf16>, vector<8x32xf32> -> vector<8x32xf32>
    %47 = arith.addf %35, %46 : vector<8x32xf32>
    %48 = vector.extract_strided_slice %0 {offsets = [0, 192], sizes = [8, 64], strides = [1, 1]} : vector<8x272xf32> to vector<8x64xf32>
    %49 = arith.truncf %48 : vector<8x64xf32> to vector<8x64xbf16>
    %cst_33 = arith.constant dense<0.000000e+00> : vector<8x100xf32>
    %50 = tpu.matmul %49, %7, %cst_33 {dimension_numbers = #tpu.dot_dimension_numbers<[1], [0], [0], [1], [0, 0, 1, 1], [], []>} : vector<8x64xbf16>, vector<64x100xbf16>, vector<8x100xf32> -> vector<8x100xf32>
    %51 = vector.broadcast %2 : vector<1x100xf32> to vector<8x100xf32>
    %52 = arith.addf %50, %51 : vector<8x100xf32>
    %cst_34 = arith.constant 0.000000e+00 : f32
    %53 = vector.broadcast %cst_34 : f32 to vector<8x100xf32>
    %54 = arith.maximumf %52, %53 : vector<8x100xf32>
    %c3_35 = arith.constant 3 : index
    %c0_36 = arith.constant 0 : index
    %c0_37 = arith.constant 0 : index
    %55 = vector.load %arg3[%c3_35, %c0_36, %c0_37] : memref<4x100x32xbf16, #tpu.memory_space<vmem>>, vector<1x100x32xbf16>
    %56 = vector.shape_cast %55 : vector<1x100x32xbf16> to vector<100x32xbf16>
    %57 = arith.truncf %54 : vector<8x100xf32> to vector<8x100xbf16>
    %cst_38 = arith.constant dense<0.000000e+00> : vector<8x32xf32>
    %58 = tpu.matmul %57, %56, %cst_38 {dimension_numbers = #tpu.dot_dimension_numbers<[1], [0], [0], [1], [0, 0, 1, 1], [], []>} : vector<8x100xbf16>, vector<100x32xbf16>, vector<8x32xf32> -> vector<8x32xf32>
    %59 = arith.addf %47, %58 : vector<8x32xf32>
    %60 = vector.broadcast %3 : vector<1x32xf32> to vector<8x32xf32>
    %61 = arith.addf %59, %60 : vector<8x32xf32>
    %cst_39 = arith.constant 0.000000e+00 : f32
    %62 = vector.broadcast %cst_39 : f32 to vector<8x32xf32>
    %63 = arith.maximumf %61, %62 : vector<8x32xf32>
    %64 = arith.truncf %63 : vector<8x32xf32> to vector<8x32xbf16>
    %cst_40 = arith.constant dense<0.000000e+00> : vector<8x32xf32>
    %65 = tpu.matmul %64, %8, %cst_40 {dimension_numbers = #tpu.dot_dimension_numbers<[1], [0], [0], [1], [0, 0, 1, 1], [], []>} : vector<8x32xbf16>, vector<32x32xbf16>, vector<8x32xf32> -> vector<8x32xf32>
    %66 = vector.broadcast %4 : vector<1x32xf32> to vector<8x32xf32>
    %67 = arith.addf %65, %66 : vector<8x32xf32>
    %68 = vector.extract_strided_slice %67 {offsets = [0, 0], sizes = [8, 16], strides = [1, 1]} : vector<8x32xf32> to vector<8x16xf32>
    %69 = vector.extract_strided_slice %67 {offsets = [0, 16], sizes = [8, 16], strides = [1, 1]} : vector<8x32xf32> to vector<8x16xf32>
    %cst_41 = arith.constant 5.000000e-01 : f32
    %70 = vector.broadcast %cst_41 : f32 to vector<8x16xf32>
    %71 = arith.mulf %70, %69 : vector<8x16xf32>
    %72 = math.exp %71 : vector<8x16xf32>
    %73 = arith.mulf %72, %1 : vector<8x16xf32>
    %74 = arith.addf %68, %73 : vector<8x16xf32>
    %75 = arith.truncf %74 : vector<8x16xf32> to vector<8x16xbf16>
    %cst_42 = arith.constant dense<0.000000e+00> : vector<8x32xf32>
    %76 = tpu.matmul %75, %9, %cst_42 {dimension_numbers = #tpu.dot_dimension_numbers<[1], [0], [0], [1], [0, 0, 1, 1], [], []>} : vector<8x16xbf16>, vector<16x32xbf16>, vector<8x32xf32> -> vector<8x32xf32>
    %77 = vector.broadcast %5 : vector<1x32xf32> to vector<8x32xf32>
    %78 = arith.addf %76, %77 : vector<8x32xf32>
    %cst_43 = arith.constant 0.000000e+00 : f32
    %79 = vector.broadcast %cst_43 : f32 to vector<8x32xf32>
    %80 = arith.maximumf %78, %79 : vector<8x32xf32>
    %81 = arith.addf %80, %63 : vector<8x32xf32>
    %c4 = arith.constant 4 : index
    %c0_44 = arith.constant 0 : index
    %82 = vector.load %arg8[%c4, %c0_44] : memref<8x400xf32, #tpu.memory_space<vmem>>, vector<1x100xf32>
    %c0_45 = arith.constant 0 : index
    %c0_46 = arith.constant 0 : index
    %c0_47 = arith.constant 0 : index
    %83 = vector.load %arg6[%c0_45, %c0_46, %c0_47] : memref<4x32x100xbf16, #tpu.memory_space<vmem>>, vector<1x32x100xbf16>
    %84 = vector.shape_cast %83 : vector<1x32x100xbf16> to vector<32x100xbf16>
    %85 = arith.truncf %81 : vector<8x32xf32> to vector<8x32xbf16>
    %cst_48 = arith.constant dense<0.000000e+00> : vector<8x100xf32>
    %86 = tpu.matmul %85, %84, %cst_48 {dimension_numbers = #tpu.dot_dimension_numbers<[1], [0], [0], [1], [0, 0, 1, 1], [], []>} : vector<8x32xbf16>, vector<32x100xbf16>, vector<8x100xf32> -> vector<8x100xf32>
    %87 = vector.broadcast %82 : vector<1x100xf32> to vector<8x100xf32>
    %88 = arith.addf %86, %87 : vector<8x100xf32>
    %cst_49 = arith.constant 0.000000e+00 : f32
    %89 = vector.broadcast %cst_49 : f32 to vector<8x100xf32>
    %90 = arith.maximumf %88, %89 : vector<8x100xf32>
    %91 = arith.addf %90, %18 : vector<8x100xf32>
    %92 = arith.truncf %91 : vector<8x100xf32> to vector<8x100xbf16>
    %cst_50 = arith.constant dense<0.000000e+00> : vector<8x64xf32>
    %93 = tpu.matmul %92, %10, %cst_50 {dimension_numbers = #tpu.dot_dimension_numbers<[1], [0], [0], [1], [0, 0, 1, 1], [], []>} : vector<8x100xbf16>, vector<100x64xbf16>, vector<8x64xf32> -> vector<8x64xf32>
    %94 = vector.broadcast %6 : vector<1x64xf32> to vector<8x64xf32>
    %95 = arith.addf %93, %94 : vector<8x64xf32>
    %96 = arith.negf %95 : vector<8x64xf32>
    %97 = math.exp %96 : vector<8x64xf32>
    %cst_51 = arith.constant 1.000000e+00 : f32
    %98 = vector.broadcast %cst_51 : f32 to vector<8x64xf32>
    %99 = arith.addf %98, %97 : vector<8x64xf32>
    %100 = arith.divf %98, %99 : vector<8x64xf32>
    %c0_52 = arith.constant 0 : index
    %c0_53 = arith.constant 0 : index
    %101 = vector.load %arg9[%c0_52, %c0_53] : memref<8x384xf32, #tpu.memory_space<vmem>>, vector<8x64xf32>
    tpu.vector_store %arg9[%c0_52, %c0_53], %100 {strides = array<i32>} : memref<8x384xf32, #tpu.memory_space<vmem>>, vector<8x64xf32>,
    %c4_54 = arith.constant 4 : index
    %c100 = arith.constant 100 : index
    %102 = vector.load %arg8[%c4_54, %c100] : memref<8x400xf32, #tpu.memory_space<vmem>>, vector<1x100xf32>
    %c1_55 = arith.constant 1 : index
    %c0_56 = arith.constant 0 : index
    %c0_57 = arith.constant 0 : index
    %103 = vector.load %arg6[%c1_55, %c0_56, %c0_57] : memref<4x32x100xbf16, #tpu.memory_space<vmem>>, vector<1x32x100xbf16>
    %104 = vector.shape_cast %103 : vector<1x32x100xbf16> to vector<32x100xbf16>
    %105 = arith.truncf %81 : vector<8x32xf32> to vector<8x32xbf16>
    %cst_58 = arith.constant dense<0.000000e+00> : vector<8x100xf32>
    %106 = tpu.matmul %105, %104, %cst_58 {dimension_numbers = #tpu.dot_dimension_numbers<[1], [0], [0], [1], [0, 0, 1, 1], [], []>} : vector<8x32xbf16>, vector<32x100xbf16>, vector<8x100xf32> -> vector<8x100xf32>
    %107 = vector.broadcast %102 : vector<1x100xf32> to vector<8x100xf32>
    %108 = arith.addf %106, %107 : vector<8x100xf32>
    %cst_59 = arith.constant 0.000000e+00 : f32
    %109 = vector.broadcast %cst_59 : f32 to vector<8x100xf32>
    %110 = arith.maximumf %108, %109 : vector<8x100xf32>
    %111 = arith.addf %110, %30 : vector<8x100xf32>
    %112 = arith.truncf %111 : vector<8x100xf32> to vector<8x100xbf16>
    %cst_60 = arith.constant dense<0.000000e+00> : vector<8x64xf32>
    %113 = tpu.matmul %112, %10, %cst_60 {dimension_numbers = #tpu.dot_dimension_numbers<[1], [0], [0], [1], [0, 0, 1, 1], [], []>} : vector<8x100xbf16>, vector<100x64xbf16>, vector<8x64xf32> -> vector<8x64xf32>
    %114 = vector.broadcast %6 : vector<1x64xf32> to vector<8x64xf32>
    %115 = arith.addf %113, %114 : vector<8x64xf32>
    %116 = arith.negf %115 : vector<8x64xf32>
    %117 = math.exp %116 : vector<8x64xf32>
    %cst_61 = arith.constant 1.000000e+00 : f32
    %118 = vector.broadcast %cst_61 : f32 to vector<8x64xf32>
    %119 = arith.addf %118, %117 : vector<8x64xf32>
    %120 = arith.divf %118, %119 : vector<8x64xf32>
    %c0_62 = arith.constant 0 : index
    %c64 = arith.constant 64 : index
    %121 = vector.load %arg9[%c0_62, %c64] : memref<8x384xf32, #tpu.memory_space<vmem>>, vector<8x64xf32>
    tpu.vector_store %arg9[%c0_62, %c64], %120 {strides = array<i32>} : memref<8x384xf32, #tpu.memory_space<vmem>>, vector<8x64xf32>,
    %c4_63 = arith.constant 4 : index
    %c200 = arith.constant 200 : index
    %122 = vector.load %arg8[%c4_63, %c200] : memref<8x400xf32, #tpu.memory_space<vmem>>, vector<1x100xf32>
    %c2_64 = arith.constant 2 : index
    %c0_65 = arith.constant 0 : index
    %c0_66 = arith.constant 0 : index
    %123 = vector.load %arg6[%c2_64, %c0_65, %c0_66] : memref<4x32x100xbf16, #tpu.memory_space<vmem>>, vector<1x32x100xbf16>
    %124 = vector.shape_cast %123 : vector<1x32x100xbf16> to vector<32x100xbf16>
    %125 = arith.truncf %81 : vector<8x32xf32> to vector<8x32xbf16>
    %cst_67 = arith.constant dense<0.000000e+00> : vector<8x100xf32>
    %126 = tpu.matmul %125, %124, %cst_67 {dimension_numbers = #tpu.dot_dimension_numbers<[1], [0], [0], [1], [0, 0, 1, 1], [], []>} : vector<8x32xbf16>, vector<32x100xbf16>, vector<8x100xf32> -> vector<8x100xf32>
    %127 = vector.broadcast %122 : vector<1x100xf32> to vector<8x100xf32>
    %128 = arith.addf %126, %127 : vector<8x100xf32>
    %cst_68 = arith.constant 0.000000e+00 : f32
    %129 = vector.broadcast %cst_68 : f32 to vector<8x100xf32>
    %130 = arith.maximumf %128, %129 : vector<8x100xf32>
    %131 = arith.addf %130, %42 : vector<8x100xf32>
    %132 = arith.truncf %131 : vector<8x100xf32> to vector<8x100xbf16>
    %cst_69 = arith.constant dense<0.000000e+00> : vector<8x64xf32>
    %133 = tpu.matmul %132, %10, %cst_69 {dimension_numbers = #tpu.dot_dimension_numbers<[1], [0], [0], [1], [0, 0, 1, 1], [], []>} : vector<8x100xbf16>, vector<100x64xbf16>, vector<8x64xf32> -> vector<8x64xf32>
    %134 = vector.broadcast %6 : vector<1x64xf32> to vector<8x64xf32>
    %135 = arith.addf %133, %134 : vector<8x64xf32>
    %136 = arith.negf %135 : vector<8x64xf32>
    %137 = math.exp %136 : vector<8x64xf32>
    %cst_70 = arith.constant 1.000000e+00 : f32
    %138 = vector.broadcast %cst_70 : f32 to vector<8x64xf32>
    %139 = arith.addf %138, %137 : vector<8x64xf32>
    %140 = arith.divf %138, %139 : vector<8x64xf32>
    %c0_71 = arith.constant 0 : index
    %c128 = arith.constant 128 : index
    %141 = vector.load %arg9[%c0_71, %c128] : memref<8x384xf32, #tpu.memory_space<vmem>>, vector<8x64xf32>
    tpu.vector_store %arg9[%c0_71, %c128], %140 {strides = array<i32>} : memref<8x384xf32, #tpu.memory_space<vmem>>, vector<8x64xf32>,
    %c4_72 = arith.constant 4 : index
    %c300 = arith.constant 300 : index
    %142 = vector.load %arg8[%c4_72, %c300] : memref<8x400xf32, #tpu.memory_space<vmem>>, vector<1x100xf32>
    %c3_73 = arith.constant 3 : index
    %c0_74 = arith.constant 0 : index
    %c0_75 = arith.constant 0 : index
    %143 = vector.load %arg6[%c3_73, %c0_74, %c0_75] : memref<4x32x100xbf16, #tpu.memory_space<vmem>>, vector<1x32x100xbf16>
    %144 = vector.shape_cast %143 : vector<1x32x100xbf16> to vector<32x100xbf16>
    %145 = arith.truncf %81 : vector<8x32xf32> to vector<8x32xbf16>
    %cst_76 = arith.constant dense<0.000000e+00> : vector<8x100xf32>
    %146 = tpu.matmul %145, %144, %cst_76 {dimension_numbers = #tpu.dot_dimension_numbers<[1], [0], [0], [1], [0, 0, 1, 1], [], []>} : vector<8x32xbf16>, vector<32x100xbf16>, vector<8x100xf32> -> vector<8x100xf32>
    %147 = vector.broadcast %142 : vector<1x100xf32> to vector<8x100xf32>
    %148 = arith.addf %146, %147 : vector<8x100xf32>
    %cst_77 = arith.constant 0.000000e+00 : f32
    %149 = vector.broadcast %cst_77 : f32 to vector<8x100xf32>
    %150 = arith.maximumf %148, %149 : vector<8x100xf32>
    %151 = arith.addf %150, %54 : vector<8x100xf32>
    %152 = arith.truncf %151 : vector<8x100xf32> to vector<8x100xbf16>
    %cst_78 = arith.constant dense<0.000000e+00> : vector<8x64xf32>
    %153 = tpu.matmul %152, %10, %cst_78 {dimension_numbers = #tpu.dot_dimension_numbers<[1], [0], [0], [1], [0, 0, 1, 1], [], []>} : vector<8x100xbf16>, vector<100x64xbf16>, vector<8x64xf32> -> vector<8x64xf32>
    %154 = vector.broadcast %6 : vector<1x64xf32> to vector<8x64xf32>
    %155 = arith.addf %153, %154 : vector<8x64xf32>
    %156 = arith.negf %155 : vector<8x64xf32>
    %157 = math.exp %156 : vector<8x64xf32>
    %cst_79 = arith.constant 1.000000e+00 : f32
    %158 = vector.broadcast %cst_79 : f32 to vector<8x64xf32>
    %159 = arith.addf %158, %157 : vector<8x64xf32>
    %160 = arith.divf %158, %159 : vector<8x64xf32>
    %c0_80 = arith.constant 0 : index
    %c192 = arith.constant 192 : index
    %161 = vector.load %arg9[%c0_80, %c192] : memref<8x384xf32, #tpu.memory_space<vmem>>, vector<8x64xf32>
    tpu.vector_store %arg9[%c0_80, %c192], %160 {strides = array<i32>} : memref<8x384xf32, #tpu.memory_space<vmem>>, vector<8x64xf32>,
    %c0_81 = arith.constant 0 : index
    %c256 = arith.constant 256 : index
    %162 = vector.load %arg9[%c0_81, %c256] : memref<8x384xf32, #tpu.memory_space<vmem>>, vector<8x32xf32>
    tpu.vector_store %arg9[%c0_81, %c256], %67 {strides = array<i32>} : memref<8x384xf32, #tpu.memory_space<vmem>>, vector<8x32xf32>,
    %c0_82 = arith.constant 0 : index
    %c288 = arith.constant 288 : index
    %163 = vector.load %arg9[%c0_82, %c288] : memref<8x384xf32, #tpu.memory_space<vmem>>, vector<8x16xf32>
    tpu.vector_store %arg9[%c0_82, %c288], %74 {strides = array<i32>} : memref<8x384xf32, #tpu.memory_space<vmem>>, vector<8x16xf32>,
    %cst_83 = arith.constant 0.000000e+00 : f32
    %164 = vector.broadcast %cst_83 : f32 to vector<8x80xf32>
    %c0_84 = arith.constant 0 : index
    %c304 = arith.constant 304 : index
    %165 = vector.load %arg9[%c0_84, %c304] : memref<8x384xf32, #tpu.memory_space<vmem>>, vector<8x80xf32>
    tpu.vector_store %arg9[%c0_84, %c304], %164 {strides = array<i32>} : memref<8x384xf32, #tpu.memory_space<vmem>>, vector<8x80xf32>,
    return
  }
  func.func @transform_0(%arg0: i32) -> (i32, i32) {
    %c0_i32 = arith.constant 0 : i32
    %c0_i32_0 = arith.constant 0 : i32
    return %arg0, %c0_i32 : i32, i32
  }
  func.func @transform_1(%arg0: i32) -> (i32, i32) {
    %c0_i32 = arith.constant 0 : i32
    %c0_i32_0 = arith.constant 0 : i32
    %c0_i32_1 = arith.constant 0 : i32
    return %c0_i32, %c0_i32_0 : i32, i32
  }
  func.func @transform_2(%arg0: i32) -> (i32, i32, i32) {
    %c0_i32 = arith.constant 0 : i32
    %c0_i32_0 = arith.constant 0 : i32
    %c0_i32_1 = arith.constant 0 : i32
    %c0_i32_2 = arith.constant 0 : i32
    return %c0_i32, %c0_i32_0, %c0_i32_1 : i32, i32, i32
  }
  func.func @transform_3(%arg0: i32) -> (i32, i32) {
    %c0_i32 = arith.constant 0 : i32
    %c0_i32_0 = arith.constant 0 : i32
    %c0_i32_1 = arith.constant 0 : i32
    return %c0_i32, %c0_i32_0 : i32, i32
  }
  func.func @transform_4(%arg0: i32) -> (i32, i32) {
    %c0_i32 = arith.constant 0 : i32
    %c0_i32_0 = arith.constant 0 : i32
    %c0_i32_1 = arith.constant 0 : i32
    return %c0_i32, %c0_i32_0 : i32, i32
  }
  func.func @transform_5(%arg0: i32) -> (i32, i32, i32) {
    %c0_i32 = arith.constant 0 : i32
    %c0_i32_0 = arith.constant 0 : i32
    %c0_i32_1 = arith.constant 0 : i32
    %c0_i32_2 = arith.constant 0 : i32
    return %c0_i32, %c0_i32_0, %c0_i32_1 : i32, i32, i32
  }
  func.func @transform_6(%arg0: i32) -> (i32, i32) {
    %c0_i32 = arith.constant 0 : i32
    %c0_i32_0 = arith.constant 0 : i32
    %c0_i32_1 = arith.constant 0 : i32
    return %c0_i32, %c0_i32_0 : i32, i32
  }
  func.func @transform_7(%arg0: i32) -> (i32, i32) {
    %c0_i32 = arith.constant 0 : i32
    %c0_i32_0 = arith.constant 0 : i32
    %c0_i32_1 = arith.constant 0 : i32
    return %c0_i32, %c0_i32_0 : i32, i32
  }
  func.func @transform_8(%arg0: i32) -> (i32, i32) {
    %c0_i32 = arith.constant 0 : i32
    %c0_i32_0 = arith.constant 0 : i32
    return %arg0, %c0_i32 : i32, i32
  }
}

</mosaic_0001>

<bundles_post_ra>
// kernel: bezier_vae_forward.1
= control target key start
LH: loop header
LB: loop body
LE: loop exit
PB: predicated region body
PF: predicated region fallthrough
CT: control target
= control target key end

     0   :  { %s2290_s27 = smov 0   ;;  %s2784_s0 = inlined_call_operand.vmem [shape: f32[16,272], index: 0, kind: input, shape index: {}]   ;;  %s2785_s1 = inlined_call_operand.vmem [shape: bf16[64,100], index: 1, kind: input, shape index: {}]   ;;  %s2786_s2 = inlined_call_operand.vmem [shape: bf16[4,100,32], index: 2, kind: input, shape index: {}]   ;;  %s2787_s3 = inlined_call_operand.vmem [shape: bf16[32,32], index: 3, kind: input, shape index: {}]   ;;  %s2788_s4 = inlined_call_operand.vmem [shape: bf16[16,32], index: 4, kind: input, shape index: {}]   ;;  %s2789_s5 = inlined_call_operand.vmem [shape: bf16[4,32,100], index: 5, kind: input, shape index: {}]   ;;  %s2790_s6 = inlined_call_operand.vmem [shape: bf16[100,64], index: 6, kind: input, shape index: {}]   ;;  %s2791_s7 = inlined_call_operand.vmem [shape: f32[8,400], index: 7, kind: input, shape index: {}]   ;;  %s2792_s8 = inlined_call_operand.vmem [shape: f32[16,384], index: 8, kind: output, shape index: {}]  }
   0x1 LB: > { %s1671_s28 = sadd.s32 4294967295, %s2234_s27   ;;  %p1675_p0 = scmp.ge.s32.totalorder %s2234_s27, 1  ;;  %s2234_s27 = sphi %s2290_s27, %s18_s27  }
   0x2   : > { %p262_p1 = scmp.lt.s32.totalorder %s2234_s27, 3 }
   0x4   : > { %p263_p2 = pnand %p1675_p0, %p262_p1 }
   0x5   : > { %p296_p3 = scmp.lt.s32.totalorder (!%p263_p2), %s1671_s28, 1  ;;  %v2301_v0 = vld [vmem:[%s2785_s1] sm:$0xff] (!%p263_p2)   ;;  %v2236_v1 = vmov (!%p263_p2), 0.0   ;;  %v2312_v2 = vld [vmem:[%s2785_s1 + $0x8] sm:$0xff] (!%p263_p2)   ;;  %vm2237_vm0 = vmmov (!%p263_p2), 0   ;;  %v2333_v3 = vld [vmem:[%s2785_s1 + $0x10] sm:$0xff] (!%p263_p2)  }
   0x6   : > { %266 = sbr.rel (%p263_p2) target bundleno = 2210 (0x8a2), region = 52  ;;  %1904 = vmatprep.subr.bf16.mxu0 (!%p263_p2), %v2236_v1  ;;  %1916 = vmatprep.subr.bf16.mxu1 (!%p263_p2), %v2236_v1  ;;  %s2238_s17 = smov (!%p263_p2), 64   ;;  %v2344_v7 = vld [vmem:[%s2785_s1 + $0x18] sm:$0xff] (!%p263_p2)   ;;  %vm367_vm1 = vcmask (!%p263_p2), 523264   ;;  %v2168_v11 = vld [vmem:[%s2786_s2 + $0x44] sm:$0xff] (!%p263_p2)   ;;  %v2170_v12 = vld [vmem:[%s2786_s2 + $0x4c] sm:$0xff] (!%p263_p2)  }
   0x7   : > { %1905 = vmatpush3.bf16.msra.mxu0 (!%p263_p2), %v2301_v0  ;;  %1917 = vmatpush3.bf16.msra.mxu1 (!%p263_p2), %v2301_v0  ;;  %v2164_v9 = vld [vmem:[%s2786_s2 + $0x34] sm:$0xff] (!%p263_p2)   ;;  %v2166_v10 = vld [vmem:[%s2786_s2 + $0x3c] sm:$0xff] (!%p263_p2)   ;;  %v2167_v17 = vld [vmem:[%s2786_s2 + $0x8] sm:$0xff] (!%p263_p2)   ;;  %vm531_vm2 = vcmask (!%p263_p2), 1041408   ;;  %vm527_vm3 = vcmask (!%p263_p2), 818176   ;;  %s2239_s12 = smov (!%p263_p2), 16  }
   0x8   : > { %1906 = vmatprep.subr.bf16.mxu0 (!%p263_p2), %v2236_v1  ;;  %1918 = vmatprep.subr.bf16.mxu1 (!%p263_p2), %v2236_v1  ;;  %v2172_v13 = vld [vmem:[%s2786_s2 + $0x54] sm:$0xff] (!%p263_p2)   ;;  %v2174_v14 = vld [vmem:[%s2786_s2 + $0x5c] sm:$0xff] (!%p263_p2)   ;;  %v2175_v21 = vld [vmem:[%s2786_s2 + $0x28] sm:$0xff] (!%p263_p2)   ;;  %vm969_vm4 = vcmask (!%p263_p2), 261120   ;;  %s2240_s18 = smov (!%p263_p2), 28   ;;  %s2241_s23 = smov (!%p263_p2), 84  }
   0x9   : > { %1912 = vmatprep.mubr.msk.bf16.mxu0 (!%p263_p2), %vm2237_vm0, %v2236_v1  ;;  %1924 = vmatprep.mubr.msk.bf16.mxu1 (!%p263_p2), %vm2237_vm0, %v2236_v1  ;;  %v2165_v15 = vld [vmem:[%s2786_s2] sm:$0xff] (!%p263_p2)   ;;  %v2169_v18 = vld [vmem:[%s2786_s2 + $0x10] sm:$0xff] (!%p263_p2)   ;;  %v2171_v19 = vld [vmem:[%s2786_s2 + $0x18] sm:$0xff] (!%p263_p2)   ;;  %s2242_s26 = smov (!%p263_p2), 56   ;;  %vm1033_vm5 = vcmask (!%p263_p2), 130048   ;;  %vm1612_vm6 = vcmask (!%p263_p2), 392448  }
   0xa   : > { %v2173_v20 = vld [vmem:[%s2786_s2 + $0x20] sm:$0xff] (!%p263_p2)   ;;  %v2177_v23 = vld [vmem:[%s2786_s2 + $0x30] ss:$0 sps:$4 sm:$0x33] (!%p263_p2)   ;;  %v2178_v34 = vld [vmem:[%s2786_s2 + $0x68] sm:$0xff] (!%p263_p2)   ;;  %vm1614_vm7 = vcmask (!%p263_p2), 1047936  }
   0xb   : > { %1907 = vmatpush3.bf16.msra.mxu0 (!%p263_p2), %v2312_v2  ;;  %1919 = vmatpush3.bf16.msra.mxu1 (!%p263_p2), %v2312_v2  ;;  %v2176_v22 = vld [vmem:[%s2786_s2 + $0x64] ss:$0 sps:$4 sm:$0x33] (!%p263_p2)   ;;  %v618_v25 = vsel (!%p263_p2), %vm531_vm2, %v2177_v23, 0  ;;  %v2424_v26 = vld [vmem:[%s2791_s7] ss:$0 sm:$0xff] (!%p263_p2) }
   0xc   : > { %1908 = vmatprep.subr.bf16.mxu0 (!%p263_p2), %v2236_v1  ;;  %1920 = vmatprep.subr.bf16.mxu1 (!%p263_p2), %v2236_v1  ;;  %v533_v24 = vsel (!%p263_p2), %vm531_vm2, %v2176_v22, 0  ;;  %v2179_v35 = vld [vmem:[%s2786_s2 + $0x70] sm:$0xff] (!%p263_p2)   ;;  %v2180_v44 = vld [vmem:[%s2786_s2 + $0x78] sm:$0xff] (!%p263_p2)   ;;  %v2181_v45 = vld [vmem:[%s2786_s2 + $0x80] sm:$0xff] (!%p263_p2)   ;;  %vm1260_vm8 = vcmask (!%p263_p2), 228352   ;;  %vm1386_vm9 = vcmask (!%p263_p2), 457728  }
   0xd   : > { %s2794_s28 = smov (!%p296_p3, %s1671_s28), 1  ;;  %v2182_v46 = vld [vmem:[%s2786_s2 + $0x88] sm:$0xff]   ;;  %v2183_v47 = vld [vmem:[%s2786_s2 + $0x90] sm:$0xff]   ;;  %v2184_v48 = vld [vmem:[%s2786_s2 + $0x98] ss:$0 sps:$4 sm:$0x33]  }
   0xe   : > { %s2142_s11 = smul.u32 24, %s2794_s28  ;;  %v763_v49 = vsel %vm531_vm2, %v2184_v48, 0  ;;  %s2243_s28 = smov 112   ;;  %vm1507_vm10 = vcmask 687104   ;;  %vm1359_vm11 = vcmask 1048064  }
   0xf   : > { %1909 = vmatpush3.bf16.msra.mxu0 %v2333_v3  ;;  %1921 = vmatpush3.bf16.msra.mxu1 %v2333_v3 }
  0x10   : > { %s2326_s14 = scalar_lea.vmem %s2784_s0, %s2142_s11  ;;  %1910 = vmatprep.subr.bf16.mxu0 %v2236_v1  ;;  %1922 = vmatprep.subr.bf16.mxu1 %v2236_v1 }
  0x11   : > { %v307_v4 = vld [vmem:[%s2326_s14] sm:$0xff]  ;;  %v308_v5 = vld [vmem:[%s2326_s14 + $0x8] sm:$0xff] }
  0x12   : > { %v342_v6 = vpack.c.bf16 %v307_v4, %v307_v4  ;;  %v2346_v8 = vpack.c.bf16 %v308_v5, %v308_v5  ;;  %v2186_v4 = vld [vmem:[%s2786_s2 + $0xa4] sm:$0xff]   ;;  %v2187_v5 = vld [vmem:[%s2786_s2 + $0xac] sm:$0xff]  }
  0x13   : > { %1911 = vmatpush3.bf16.msra.mxu0 %v2344_v7  ;;  %1923 = vmatpush3.bf16.msra.mxu1 %v2344_v7 }
  0x14   : > { %427 = vrot.lane.b32.xlu0 %v342_v6, %s2238_s17  ;;  %1928 = vmatprep.subr.bf16.mxu0 %v2236_v1 }
  0x15   : > { %1946 = vmatprep.subr.bf16.mxu1 %v2236_v1 }
  0x16   : > { %1913 = vmatmul.mubr.msk.bf16.vlgmr.msra.gmra.mrb[0].mxu0 %vm367_vm1, %v342_v6  ;;  %v2188_v6 = vld [vmem:[%s2786_s2 + $0xb4] sm:$0xff]  }
  0x17   : > { %1929 = vmatpush3.bf16.msra.mxu0 %v2164_v9  ;;  %1942 = vmatprep.mubr.msk.bf16.mxu0 %vm2237_vm0, %v2236_v1 }
  0x18   : > { %807 = vrot.lane.b32.xlu0 %v2346_v8, %s2238_s17  ;;  %1930 = vmatprep.subr.bf16.mxu0 %v2236_v1 }
  0x1b   : > { %1931 = vmatpush3.bf16.msra.mxu0 %v2166_v10 }
  0x1c   : > { %1932 = vmatprep.subr.bf16.mxu0 %v2236_v1 }
  0x1f   : > { %1933 = vmatpush3.bf16.msra.mxu0 %v2168_v11  ;;  %v2189_v11 = vld [vmem:[%s2786_s2 + $0xbc] sm:$0xff]  }
  0x20   : > { %1934 = vmatprep.subr.bf16.mxu0 %v2236_v1 }
  0x23   : > { %1935 = vmatpush3.bf16.msra.mxu0 %v2170_v12 }
  0x24   : > { %1936 = vmatprep.subr.bf16.mxu0 %v2236_v1 }
  0x27   : > { %1937 = vmatpush3.bf16.msra.mxu0 %v2172_v13  ;;  %v2190_v13 = vld [vmem:[%s2786_s2 + $0xc4] sm:$0xff]  }
  0x28   : > { %1938 = vmatprep.subr.bf16.mxu0 %v2236_v1 }
  0x2b   : > { %1939 = vmatpush3.bf16.msra.mxu0 %v2174_v14  ;;  %v2191_v14 = vld [vmem:[%s2786_s2 + $0xcc] ss:$0 sps:$4 sm:$0x33]  }
  0x2c   : > { %1940 = vmatprep.subr.bf16.mxu0 %v2236_v1 }
  0x2f   : > { %1941 = vmatpush3.bf16.msra.mxu0 %v533_v24 }
  0x30   : > { %1964 = vmatprep.subr.bf16.mxu0 %v2236_v1 }
  0x86   : > { %v428_v16 = vpop.permute.xlu0 %427 }
  0x87   : > { %1925 = vmatmul.mubr.msk.bf16.vlgmr.msra.gmra.mrb[0].mxu1 %vm367_vm1, %v428_v16  ;;  %v911_v16 = vsel %vm531_vm2, %v2191_v14, 0  ;;  %v2669_v14 = vld [vmem:[%s2790_s6 + $0x20] sm:$0xff]  }
  0x88   : > { %1947 = vmatpush3.bf16.msra.mxu1 %v2165_v15  ;;  %1960 = vmatprep.mubr.msk.bf16.mxu1 %vm2237_vm0, %v2236_v1 }
  0x89   : > { %1948 = vmatprep.subr.bf16.mxu1 %v2236_v1 }
  0x8a   : > { %v808_v43 = vpop.permute.xlu0 %807 }
  0x8c   : > { %1949 = vmatpush3.bf16.msra.mxu1 %v2167_v17 }
  0x8d   : > { %1950 = vmatprep.subr.bf16.mxu1 %v2236_v1 }
  0x90   : > { %1951 = vmatpush3.bf16.msra.mxu1 %v2169_v18  ;;  %v2192_v18 = vld [vmem:[%s2787_s3] sm:$0xff]  }
  0x91   : > { %1952 = vmatprep.subr.bf16.mxu1 %v2236_v1 }
  0x94   : > { %1953 = vmatpush3.bf16.msra.mxu1 %v2171_v19  ;;  %v2193_v19 = vld [vmem:[%s2787_s3 + $0x8] sm:$0xff]  }
  0x95   : > { %1954 = vmatprep.subr.bf16.mxu1 %v2236_v1 }
  0x98   : > { %1955 = vmatpush3.bf16.msra.mxu1 %v2173_v20  ;;  %v309_v20 = vld [vmem:[%s2326_s14 + $0x10] sm:$0xff] }
  0x99   : > { %1956 = vmatprep.subr.bf16.mxu1 %v2236_v1  ;;  %1017 = vrot.lane.b32.xlu1 %v309_v20, %s2239_s12  ;;  %s2587_s12 = scalar_lea.vmem %s2792_s8, %s2142_s11  ;;  %s2244_s11 = smov 32  }
  0x9c   : > { %1957 = vmatpush3.bf16.msra.mxu1 %v2175_v21 }
  0x9d   : > { %1958 = vmatprep.subr.bf16.mxu1 %v2236_v1 }
  0xa0   : > { %1959 = vmatpush3.bf16.msra.mxu1 %v618_v25 }
  0xa1   : > { %1976 = vmatprep.subr.bf16.mxu1 %v2236_v1 }
  0xe9   : > { %v405_v27 = vpop.f32.mrb[0].mxu0 }
  0xea   : > { %v406_v28 = vadd.f32 %v405_v27, %v2424_v26  ;;  %v1914_v29 = vpop.f32.mrb[1].mxu0 }
  0xeb   : > { %v408_v30 = vpop.f32.mrb[2].mxu0 }
  0xec   : > { %v2427_v31 = vmax.f32 %v406_v28, 0.0  ;;  %v1915_v32 = vpop.f32.mrb[3].mxu0 }
  0xee   : > { %v425_v33 = vpack.c.bf16 %v2427_v31, %v2427_v31 }
  0xf0   : > { %1961 = vmatmul.mubr.msk.bf16.vlgmr.msra.gmra.mrb[4].mxu1 %vm527_vm3, %v425_v33 }
  0xf1   : > { %1990 = vmatprep.mubr.msk.bf16.mxu1 %vm2237_vm0, %v2236_v1  ;;  %1977 = vmatpush3.bf16.msra.mxu1 %v2178_v34 }
  0xf2   : > { %1978 = vmatprep.subr.bf16.mxu1 %v2236_v1 }
  0xf5   : > { %1979 = vmatpush3.bf16.msra.mxu1 %v2179_v35 }
  0xf6   : > { %1980 = vmatprep.subr.bf16.mxu1 %v2236_v1 }
  0xf9   : > { %1981 = vmatpush3.bf16.msra.mxu1 %v2180_v44 }
  0xfa   : > { %1982 = vmatprep.subr.bf16.mxu1 %v2236_v1 }
  0xfd   : > { %1983 = vmatpush3.bf16.msra.mxu1 %v2181_v45 }
  0xfe   : > { %1984 = vmatprep.subr.bf16.mxu1 %v2236_v1 }
 0x101   : > { %1985 = vmatpush3.bf16.msra.mxu1 %v2182_v46 }
 0x102   : > { %1986 = vmatprep.subr.bf16.mxu1 %v2236_v1 }
 0x105   : > { %1987 = vmatpush3.bf16.msra.mxu1 %v2183_v47 }
 0x106   : > { %1988 = vmatprep.subr.bf16.mxu1 %v2236_v1 }
 0x109   : > { %1989 = vmatpush3.bf16.msra.mxu1 %v763_v49 }
 0x10a   : > { %2006 = vmatprep.subr.bf16.mxu1 %v2236_v1 }
 0x10b   : > { %v1018_v49 = vpop.permute.xlu1 %1017 }
 0x15a   : > { %v466_v36 = vpop.f32.mrb[0].mxu1 }
 0x15b   : > { %v467_v37 = vadd.f32 %v466_v36, %v2424_v26  ;;  %v1926_v38 = vpop.f32.mrb[1].mxu1  ;;  %v2561_v36 = vld [vmem:[%s2791_s7 + $0x4] ss:$0 sm:$0xff] }
 0x15c   : > { %v469_v39 = vpop.f32.mrb[2].mxu1  ;;  %1256 = vrot.lane.b32.xlu0 %v2561_v36, %s2240_s18  ;;  %v2570_v38 = vld [vmem:[%s2791_s7 + $0x14] ss:$0 sm:$0xff] }
 0x15d   : > { %v2443_v40 = vmax.f32 %v467_v37, 0.0  ;;  %v1927_v41 = vpop.f32.mrb[3].mxu1  ;;  %v2194_v37 = vld [vmem:[%s2788_s4] sm:$0xff]   ;;  %v1361_v39 = vld [vmem:[%s2791_s7 + $0xc] ss:$0 sm:$0xff] }
 0x15e   : > { %v312_v41 = vld [vmem:[%s2791_s7 + $0x2] ss:$0 sm:$0xff] }
 0x15f   : > { %v487_v42 = vpack.c.bf16 %v2443_v40, %v2443_v40 }
 0x160   : > { %1503 = vrot.lane.b32.xlu0 %v2570_v38, %s2241_s23 }
 0x161   : > { %1943 = vmatmul.mubr.msk.bf16.vlgmr.msra.gmra.mrb[4].mxu0 %vm527_vm3, %v487_v42 }
 0x162   : > { %1965 = vmatpush3.bf16.msra.mxu0 %v2301_v0  ;;  %1972 = vmatprep.mubr.msk.bf16.mxu0 %vm2237_vm0, %v2236_v1 }
 0x163   : > { %1966 = vmatprep.subr.bf16.mxu0 %v2236_v1 }
 0x164   : > { %1382 = vrot.lane.b32.xlu0 %v1361_v39, %s2242_s26 }
 0x166   : > { %1967 = vmatpush3.bf16.msra.mxu0 %v2312_v2 }
 0x167   : > { %1968 = vmatprep.subr.bf16.mxu0 %v2236_v1 }
 0x16a   : > { %1969 = vmatpush3.bf16.msra.mxu0 %v2333_v3 }
 0x16b   : > { %1970 = vmatprep.subr.bf16.mxu0 %v2236_v1 }
 0x16e   : > { %1971 = vmatpush3.bf16.msra.mxu0 %v2344_v7 }
 0x16f   : > { %1994 = vmatprep.subr.bf16.mxu0 %v2236_v1 }
 0x171   : > { %1973 = vmatmul.mubr.msk.bf16.vlgmr.msra.gmra.mrb[8].mxu0 %vm367_vm1, %v2346_v8 }
 0x172   : > { %1995 = vmatpush3.bf16.msra.mxu0 %v2301_v0  ;;  %2002 = vmatprep.mubr.msk.bf16.mxu0 %vm2237_vm0, %v2236_v1 }
 0x173   : > { %1996 = vmatprep.subr.bf16.mxu0 %v2236_v1 }
 0x176   : > { %1997 = vmatpush3.bf16.msra.mxu0 %v2312_v2  ;;  %v2185_v2 = vld [vmem:[%s2786_s2 + $0x9c] sm:$0xff]  }
 0x177   : > { %1998 = vmatprep.subr.bf16.mxu0 %v2236_v1 }
 0x17a   : > { %1999 = vmatpush3.bf16.msra.mxu0 %v2333_v3 }
 0x17b   : > { %2000 = vmatprep.subr.bf16.mxu0 %v2236_v1 }
 0x17e   : > { %2001 = vmatpush3.bf16.msra.mxu0 %v2344_v7 }
 0x17f   : > { %2024 = vmatprep.subr.bf16.mxu0 %v2236_v1 }
 0x181   : > { %2003 = vmatmul.mubr.msk.bf16.vlgmr.msra.gmra.mrb[12].mxu0 %vm367_vm1, %v808_v43 }
 0x182   : > { %2028 = vmatprep.mubr.msk.bf16.mxu0 %vm2237_vm0, %v2236_v1  ;;  %2025 = vmatpush3.bf16.msra.mxu0 %v2192_v18 }
 0x183   : > { %2026 = vmatprep.subr.bf16.mxu0 %v2236_v1 }
 0x186   : > { %2027 = vmatpush3.bf16.msra.mxu0 %v2193_v19  ;;  %v1483_v19 = vld [vmem:[%s2791_s7 + $0x1c] ss:$0 sm:$0xff] }
 0x187   : > { %2032 = vmatprep.subr.bf16.mxu0 %v2236_v1 }
 0x1c3   : > { %v654_v50 = vpop.f32.mrb[4].mxu1 }
 0x1c4   : > { %v1962_v51 = vpop.f32.mrb[5].mxu1 }
 0x1c5   : > { %v657_v52 = vpop.f32.mrb[6].mxu1 }
 0x1c6   : > { %v1963_v53 = vpop.f32.mrb[7].mxu1 }
 0x234   : > { %v569_v54 = vpop.f32.mrb[4].mxu0 }
 0x235   : > { %v655_v55 = vadd.f32 %v654_v50, %v569_v54  ;;  %v1944_v56 = vpop.f32.mrb[5].mxu0 }
 0x236   : > { %v572_v57 = vpop.f32.mrb[6].mxu0  ;;  %v2196_v56 = vld [vmem:[%s2789_s5] sm:$0xff]  }
 0x237   : > { %v1945_v58 = vpop.f32.mrb[7].mxu0  ;;  %v2197_v57 = vld [vmem:[%s2789_s5 + $0x18] sm:$0xff]  }
 0x238   : > { %v2198_v58 = vld [vmem:[%s2789_s5 + $0x8] sm:$0xff]  }
 0x244   : > { %v698_v59 = vpop.f32.mrb[8].mxu0 }
 0x245   : > { %v699_v60 = vadd.f32 %v698_v59, %v2424_v26  ;;  %v1974_v61 = vpop.f32.mrb[9].mxu0  ;;  %v2609_v59 = vpop.permute.xlu0 %1256 }
 0x246   : > { %v701_v62 = vpop.f32.mrb[10].mxu0 }
 0x247   : > { %v2495_v63 = vmax.f32 %v699_v60, 0.0  ;;  %v1975_v0 = vpop.f32.mrb[11].mxu0 }
 0x248   : > { %v313_v0 = vld [vmem:[%s2791_s7 + $0x3] ss:$0 sm:$0xff] }
 0x249   : > { %v719_v3 = vpack.c.bf16 %v2495_v63, %v2495_v63  ;;  %v2611_v60 = vpop.permute.xlu0 %1503 }
 0x24b   : > { %1991 = vmatmul.mubr.msk.bf16.vlgmr.msra.gmra.mrb[8].mxu1 %vm527_vm3, %v719_v3 }
 0x24c   : > { %2007 = vmatpush3.bf16.msra.mxu1 %v2185_v2  ;;  %2020 = vmatprep.mubr.msk.bf16.mxu1 %vm2237_vm0, %v2236_v1 }
 0x24d   : > { %2008 = vmatprep.subr.bf16.mxu1 %v2236_v1  ;;  %v2613_v61 = vpop.permute.xlu0 %1382 }
 0x250   : > { %2009 = vmatpush3.bf16.msra.mxu1 %v2186_v4 }
 0x251   : > { %2010 = vmatprep.subr.bf16.mxu1 %v2236_v1 }
 0x254   : > { %2011 = vmatpush3.bf16.msra.mxu1 %v2187_v5  ;;  %v846_v7 = vpop.f32.mrb[12].mxu0 }
 0x255   : > { %2012 = vmatprep.subr.bf16.mxu1 %v2236_v1  ;;  %v2004_v8 = vpop.f32.mrb[13].mxu0  ;;  %v847_v12 = vadd.f32 %v846_v7, %v2424_v26  ;;  %v311_v26 = vld [vmem:[%s2791_s7 + $0x1] ss:$0 sm:$0xff] }
 0x256   : > { %v849_v9 = vpop.f32.mrb[14].mxu0 }
 0x257   : > { %v2005_v10 = vpop.f32.mrb[15].mxu0  ;;  %v2529_v15 = vmax.f32 %v847_v12, 0.0  ;;  %v2625_v9 = vld [vmem:[%s2790_s6] sm:$0xff]   ;;  %v2651_v12 = vld [vmem:[%s2790_s6 + $0x10] sm:$0xff]  }
 0x258   : > { %2013 = vmatpush3.bf16.msra.mxu1 %v2188_v6 }
 0x259   : > { %2014 = vmatprep.subr.bf16.mxu1 %v2236_v1  ;;  %v867_v17 = vpack.c.bf16 %v2529_v15, %v2529_v15 }
 0x25c   : > { %2015 = vmatpush3.bf16.msra.mxu1 %v2189_v11  ;;  %v2638_v11 = vld [vmem:[%s2790_s6 + $0x8] sm:$0xff]  }
 0x25d   : > { %2016 = vmatprep.subr.bf16.mxu1 %v2236_v1 }
 0x260   : > { %2017 = vmatpush3.bf16.msra.mxu1 %v2190_v13  ;;  %v2660_v13 = vld [vmem:[%s2790_s6 + $0x18] sm:$0xff]  }
 0x261   : > { %2018 = vmatprep.subr.bf16.mxu1 %v2236_v1 }
 0x264   : > { %2019 = vmatpush3.bf16.msra.mxu1 %v911_v16  ;;  %v2680_v16 = vld [vmem:[%s2790_s6 + $0x28] sm:$0xff]  }
 0x265   : > { %2064 = vmatprep.subr.bf16.mxu1 %v2236_v1 }
 0x267   : > { %2021 = vmatmul.mubr.msk.bf16.vlgmr.msra.gmra.mrb[12].mxu1 %vm527_vm3, %v867_v17  ;;  %v2205_v17 = vld [vmem:[%s2790_s6 + $0x30] ss:$0 sps:$4 sm:$0x33]  }
 0x268   : > { %2068 = vmatprep.mubr.msk.bf16.mxu1 %vm2237_vm0, %v2236_v1  ;;  %v2690_v18 = vsel %vm531_vm2, %v2205_v17, 0 }
 0x31e   : > { %v799_v21 = vpop.f32.mrb[8].mxu1 }
 0x31f   : > { %v805_v22 = vadd.f32 %v799_v21, %v655_v55  ;;  %v1992_v23 = vpop.f32.mrb[9].mxu1  ;;  %v2195_v55 = vld [vmem:[%s2789_s5 + $0x10] sm:$0xff]  }
 0x320   : > { %v802_v24 = vpop.f32.mrb[10].mxu1  ;;  %2065 = vmatpush3.bf16.msra.mxu1 %v2195_v55 }
 0x321   : > { %v1993_v25 = vpop.f32.mrb[11].mxu1  ;;  %2066 = vmatprep.subr.bf16.mxu1 %v2236_v1 }
 0x324   : > { %2067 = vmatpush3.bf16.msra.mxu1 %v2197_v57 }
 0x325   : > { %2072 = vmatprep.subr.bf16.mxu1 %v2236_v1 }
 0x33a   : > { %v947_v27 = vpop.f32.mrb[12].mxu1 }
 0x33b   : > { %v953_v28 = vadd.f32 %v947_v27, %v805_v22  ;;  %v2022_v29 = vpop.f32.mrb[13].mxu1 }
 0x33c   : > { %v950_v30 = vpop.f32.mrb[14].mxu1 }
 0x33d   : > { %v954_v32 = vadd.f32 %v953_v28, %v311_v26  ;;  %v2023_v33 = vpop.f32.mrb[15].mxu1 }
 0x33f   : > { %v2551_v34 = vmax.f32 %v954_v32, 0.0 }
 0x341   : > { %v956_v35 = vpack.c.bf16 %v2551_v34, %v2551_v34 }
 0x343   : > { %2029 = vmatmul.mubr.msk.bf16.vlgmr.msra.gmra.mrb[16].mxu0 %vm969_vm4, %v956_v35 }
 0x344   : > { %2034 = vmatprep.mubr.msk.bf16.mxu0 %vm2237_vm0, %v2236_v1  ;;  %2033 = vmatpush3.bf16.msra.mxu0 %v2194_v37 }
 0x345   : > { %2038 = vmatprep.subr.bf16.mxu0 %v2236_v1 }
 0x416   : > { %v1007_v42 = vpop.f32.mrb[16].mxu0 }
 0x417   : > { %v1008_v43 = vadd.f32 %v1007_v42, %v312_v41  ;;  %v2030_v44 = vpop.f32.mrb[17].mxu0 }
 0x418   : > { %v1010_v45 = vpop.f32.mrb[18].mxu0 }
 0x419   : > { %v1013_v46 = vmul.f32 0.5, %v1008_v43  ;;  %1607 = vst.msk [vmem:[%s2587_s12 + $0x10] sm:$0xff] %vm969_vm4, %v1008_v43  ;;  %v2031_v47 = vpop.f32.mrb[19].mxu0 }
 0x41b   : > { %v1014_v48 = vmul.f32 1.442695, %v1013_v46 }
 0x41d   : > { %2210 = vpow2.f32 %v1014_v48 }
 0x427   : > { %v2211_v50 = vpop.eup %2210 }
 0x428   : > { %v1020_v51 = vmul.f32 %v2211_v50, %v1018_v49 }
 0x42a   : > { %1022 = vrot.lane.b32.xlu1 %v1020_v51, %s2243_s28 }
 0x42e   : > { %1258 = vrot.lane.b32.xlu1 %v1361_v39, %s2240_s18 }
 0x432   : > { %1505 = vrot.lane.b32.xlu1 %v1483_v19, %s2241_s23 }
 0x436   : > { %1384 = vrot.lane.b32.xlu1 %v2570_v38, %s2242_s26  ;;  %v2206_v38 = vld [vmem:[%s2789_s5 + $0x30] sm:$0xff]  }
 0x49c   : > { %v1023_v52 = vpop.permute.xlu1 %1022 }
 0x49d   : > { %v1025_v53 = vadd.f32 %v1023_v52, %v1008_v43  ;;  %v314_v43 = vld [vmem:[%s2791_s7 + $0x5] ss:$0 sm:$0xff] }
 0x49f   : > { %v1026_v54 = vpack.c.bf16 %v1025_v53, %v1025_v53  ;;  %1609 = vrot.lane.b32.xlu0 %v1025_v53, %s2244_s11 }
 0x4a0   : > { %v1259_v20 = vpop.permute.xlu1 %1258 }
 0x4a1   : > { %2035 = vmatmul.mubr.msk.bf16.vlgmr.msra.gmra.mrb[20].mxu0 %vm1033_vm5, %v1026_v54  ;;  %v1261_v21 = vsel %vm1260_vm8, %v2609_v59, %v1259_v20 }
 0x4a2   : > { %2042 = vmatprep.mubr.msk.bf16.mxu0 %vm2237_vm0, %v2236_v1  ;;  %2039 = vmatpush3.bf16.msra.mxu0 %v2196_v56 }
 0x4a3   : > { %2040 = vmatprep.subr.bf16.mxu0 %v2236_v1 }
 0x4a4   : > { %v1506_v42 = vpop.permute.xlu1 %1505 }
 0x4a5   : > { %v1508_v57 = vsel %vm1507_vm10, %v2611_v60, %v1506_v42 }
 0x4a6   : > { %2041 = vmatpush3.bf16.msra.mxu0 %v2198_v58 }
 0x4a7   : > { %2046 = vmatprep.subr.bf16.mxu0 %v2236_v1 }
 0x4a8   : > { %v1385_v44 = vpop.permute.xlu1 %1384 }
 0x4a9   : > { %v1387_v56 = vsel %vm1386_vm9, %v2613_v61, %v1385_v44 }
 0x511   : > { %v1610_v62 = vpop.permute.xlu0 %1609 }
 0x512   : > { %1613 = vst.msk [vmem:[%s2587_s12 + $0x10] sm:$0xff] %vm1612_vm6, %v1610_v62 }
 0x513   : > { %1615 = vst.msk [vmem:[%s2587_s12 + $0x10] sm:$0xff] %vm1614_vm7, %v2236_v1 }
 0x574   : > { %v1071_v2 = vpop.f32.mrb[20].mxu0 }
 0x575   : > { %v1072_v3 = vadd.f32 %v1071_v2, %v313_v0  ;;  %v2036_v4 = vpop.f32.mrb[21].mxu0 }
 0x576   : > { %v1074_v5 = vpop.f32.mrb[22].mxu0 }
 0x577   : > { %v1077_v6 = vmax.f32 %v1072_v3, 0.0  ;;  %v2037_v7 = vpop.f32.mrb[23].mxu0 }
 0x579   : > { %v1078_v8 = vadd.f32 %v1077_v6, %v2551_v34 }
 0x57b   : > { %v2627_v10 = vpack.c.bf16 %v1078_v8, %v1078_v8 }
 0x57d   : > { %2043 = vmatmul.mubr.msk.bf16.vlgmr.msra.gmra.mrb[24].mxu0 %vm969_vm4, %v2627_v10  ;;  %2069 = vmatmul.mubr.msk.bf16.vlgmr.msra.gmra.mrb[16].mxu1 %vm969_vm4, %v2627_v10 }
 0x57e   : > { %2073 = vmatpush3.bf16.msra.mxu1 %v2625_v9  ;;  %2047 = vmatpush3.bf16.msra.mxu0 %v2625_v9 }
 0x57f   : > { %2074 = vmatprep.subr.bf16.mxu1 %v2236_v1  ;;  %2048 = vmatprep.subr.bf16.mxu0 %v2236_v1 }
 0x580   : > { %2060 = vmatprep.mubr.msk.bf16.mxu0 %vm2237_vm0, %v2236_v1  ;;  %2086 = vmatprep.mubr.msk.bf16.mxu1 %vm2237_vm0, %v2236_v1 }
 0x582   : > { %2075 = vmatpush3.bf16.msra.mxu1 %v2638_v11  ;;  %2049 = vmatpush3.bf16.msra.mxu0 %v2638_v11 }
 0x583   : > { %2076 = vmatprep.subr.bf16.mxu1 %v2236_v1  ;;  %2050 = vmatprep.subr.bf16.mxu0 %v2236_v1 }
 0x586   : > { %2077 = vmatpush3.bf16.msra.mxu1 %v2651_v12  ;;  %2051 = vmatpush3.bf16.msra.mxu0 %v2651_v12 }
 0x587   : > { %2078 = vmatprep.subr.bf16.mxu1 %v2236_v1  ;;  %2052 = vmatprep.subr.bf16.mxu0 %v2236_v1 }
 0x58a   : > { %2079 = vmatpush3.bf16.msra.mxu1 %v2660_v13  ;;  %2053 = vmatpush3.bf16.msra.mxu0 %v2660_v13 }
 0x58b   : > { %2080 = vmatprep.subr.bf16.mxu1 %v2236_v1  ;;  %2054 = vmatprep.subr.bf16.mxu0 %v2236_v1 }
 0x58e   : > { %2081 = vmatpush3.bf16.msra.mxu1 %v2669_v14  ;;  %2055 = vmatpush3.bf16.msra.mxu0 %v2669_v14 }
 0x58f   : > { %2082 = vmatprep.subr.bf16.mxu1 %v2236_v1  ;;  %2056 = vmatprep.subr.bf16.mxu0 %v2236_v1 }
 0x592   : > { %2083 = vmatpush3.bf16.msra.mxu1 %v2680_v16  ;;  %2057 = vmatpush3.bf16.msra.mxu0 %v2680_v16 }
 0x593   : > { %2084 = vmatprep.subr.bf16.mxu1 %v2236_v1  ;;  %2058 = vmatprep.subr.bf16.mxu0 %v2236_v1 }
 0x596   : > { %2085 = vmatpush3.bf16.msra.mxu1 %v2690_v18  ;;  %2059 = vmatpush3.bf16.msra.mxu0 %v2690_v18 }
 0x597   : > { %2116 = vmatprep.subr.bf16.mxu1 %v2236_v1  ;;  %2090 = vmatprep.subr.bf16.mxu0 %v2236_v1 }
 0x650   : > { %v1134_v22 = vpop.f32.mrb[24].mxu0  ;;  %v1297_v23 = vpop.f32.mrb[16].mxu1 }
 0x651   : > { %v1135_v24 = vadd.f32 %v2561_v36, %v1134_v22  ;;  %v1298_v25 = vadd.f32 %v1297_v23, %v1261_v21  ;;  %v2044_v26 = vpop.f32.mrb[25].mxu0  ;;  %v2070_v27 = vpop.f32.mrb[17].mxu1  ;;  %v2207_v36 = vld [vmem:[%s2789_s5 + $0x20] sm:$0xff]  }
 0x652   : > { %v1137_v28 = vpop.f32.mrb[26].mxu0  ;;  %v1300_v29 = vpop.f32.mrb[18].mxu1 }
 0x653   : > { %v1140_v30 = vmax.f32 %v1135_v24, 0.0  ;;  %v1303_v32 = vmax.f32 %v1298_v25, 0.0  ;;  %v2045_v33 = vpop.f32.mrb[27].mxu0  ;;  %v2071_v34 = vpop.f32.mrb[19].mxu1 }
 0x655   : > { %v1141_v35 = vadd.f32 %v1140_v30, %v2427_v31  ;;  %v1304_v37 = vadd.f32 %v1303_v32, %v2443_v40  ;;  %v2208_v31 = vld [vmem:[%s2789_s5 + $0x38] sm:$0xff]   ;;  %v2209_v40 = vld [vmem:[%s2789_s5 + $0x28] sm:$0xff]  }
 0x657   : > { %v1142_v39 = vpack.c.bf16 %v1141_v35, %v1141_v35  ;;  %v1305_v41 = vpack.c.bf16 %v1304_v37, %v1304_v37 }
 0x659   : > { %2061 = vmatmul.mubr.msk.bf16.vlgmr.msra.gmra.mrb[28].mxu0 %vm527_vm3, %v1142_v39  ;;  %2087 = vmatmul.mubr.msk.bf16.vlgmr.msra.gmra.mrb[20].mxu1 %vm527_vm3, %v1305_v41 }
 0x65a   : > { %2117 = vmatpush3.bf16.msra.mxu1 %v2206_v38  ;;  %2091 = vmatpush3.bf16.msra.mxu0 %v2207_v36 }
 0x65b   : > { %2118 = vmatprep.subr.bf16.mxu1 %v2236_v1  ;;  %2092 = vmatprep.subr.bf16.mxu0 %v2236_v1 }
 0x65c   : > { %2094 = vmatprep.mubr.msk.bf16.mxu0 %vm2237_vm0, %v2236_v1  ;;  %2120 = vmatprep.mubr.msk.bf16.mxu1 %vm2237_vm0, %v2236_v1 }
 0x65e   : > { %2119 = vmatpush3.bf16.msra.mxu1 %v2208_v31  ;;  %2093 = vmatpush3.bf16.msra.mxu0 %v2209_v40 }
 0x65f   : > { %2098 = vmatprep.subr.bf16.mxu0 %v2236_v1  ;;  %2124 = vmatprep.subr.bf16.mxu1 %v2236_v1 }
 0x661   : > { %2095 = vmatmul.mubr.msk.bf16.vlgmr.msra.gmra.mrb[32].mxu0 %vm969_vm4, %v2627_v10  ;;  %2121 = vmatmul.mubr.msk.bf16.vlgmr.msra.gmra.mrb[24].mxu1 %vm969_vm4, %v2627_v10 }
 0x662   : > { %2099 = vmatpush3.bf16.msra.mxu0 %v2625_v9  ;;  %2125 = vmatpush3.bf16.msra.mxu1 %v2625_v9 }
 0x663   : > { %2100 = vmatprep.subr.bf16.mxu0 %v2236_v1  ;;  %2126 = vmatprep.subr.bf16.mxu1 %v2236_v1 }
 0x664   : > { %2112 = vmatprep.mubr.msk.bf16.mxu0 %vm2237_vm0, %v2236_v1  ;;  %2138 = vmatprep.mubr.msk.bf16.mxu1 %vm2237_vm0, %v2236_v1 }
 0x666   : > { %2101 = vmatpush3.bf16.msra.mxu0 %v2638_v11  ;;  %2127 = vmatpush3.bf16.msra.mxu1 %v2638_v11 }
 0x667   : > { %2102 = vmatprep.subr.bf16.mxu0 %v2236_v1  ;;  %2128 = vmatprep.subr.bf16.mxu1 %v2236_v1 }
 0x66a   : > { %2103 = vmatpush3.bf16.msra.mxu0 %v2651_v12  ;;  %2129 = vmatpush3.bf16.msra.mxu1 %v2651_v12 }
 0x66b   : > { %2104 = vmatprep.subr.bf16.mxu0 %v2236_v1  ;;  %2130 = vmatprep.subr.bf16.mxu1 %v2236_v1 }
 0x66e   : > { %2105 = vmatpush3.bf16.msra.mxu0 %v2660_v13  ;;  %2131 = vmatpush3.bf16.msra.mxu1 %v2660_v13 }
 0x66f   : > { %2106 = vmatprep.subr.bf16.mxu0 %v2236_v1  ;;  %2132 = vmatprep.subr.bf16.mxu1 %v2236_v1 }
 0x672   : > { %2107 = vmatpush3.bf16.msra.mxu0 %v2669_v14  ;;  %2133 = vmatpush3.bf16.msra.mxu1 %v2669_v14 }
 0x673   : > { %2108 = vmatprep.subr.bf16.mxu0 %v2236_v1  ;;  %2134 = vmatprep.subr.bf16.mxu1 %v2236_v1 }
 0x676   : > { %2109 = vmatpush3.bf16.msra.mxu0 %v2680_v16  ;;  %2135 = vmatpush3.bf16.msra.mxu1 %v2680_v16 }
 0x677   : > { %2110 = vmatprep.subr.bf16.mxu0 %v2236_v1  ;;  %2136 = vmatprep.subr.bf16.mxu1 %v2236_v1 }
 0x67a   : > { %2111 = vmatpush3.bf16.msra.mxu0 %v2690_v18  ;;  %2137 = vmatpush3.bf16.msra.mxu1 %v2690_v18 }
 0x72c   : > { %v1222_v45 = vpop.f32.mrb[28].mxu0  ;;  %v1343_v46 = vpop.f32.mrb[20].mxu1 }
 0x72d   : > { %v1223_v47 = vadd.f32 %v1222_v45, %v314_v43  ;;  %v1344_v48 = vadd.f32 %v1343_v46, %v314_v43  ;;  %v2062_v49 = vpop.f32.mrb[29].mxu0  ;;  %v2088_v50 = vpop.f32.mrb[21].mxu1 }
 0x72e   : > { %v1225_v51 = vpop.f32.mrb[30].mxu0  ;;  %v1346_v52 = vpop.f32.mrb[22].mxu1 }
 0x72f   : > { %v1773_v1 = vmul.f32 -1.442695, %v1223_v47  ;;  %v1782_v53 = vmul.f32 -1.442695, %v1344_v48  ;;  %v2063_v54 = vpop.f32.mrb[31].mxu0  ;;  %v2089_v55 = vpop.f32.mrb[23].mxu1 }
 0x731   : > { %2212 = vpow2.f32 %v1773_v1 }
 0x732   : > { %2214 = vpow2.f32 %v1782_v53 }
 0x734   : > { %v1423_v58 = vpop.f32.mrb[32].mxu0  ;;  %v1544_v59 = vpop.f32.mrb[24].mxu1 }
 0x735   : > { %v1424_v62 = vadd.f32 %v1423_v58, %v1387_v56  ;;  %v1545_v0 = vadd.f32 %v1544_v59, %v1508_v57  ;;  %v2096_v2 = vpop.f32.mrb[33].mxu0  ;;  %v2122_v3 = vpop.f32.mrb[25].mxu1 }
 0x736   : > { %v1426_v4 = vpop.f32.mrb[34].mxu0  ;;  %v1547_v5 = vpop.f32.mrb[26].mxu1 }
 0x737   : > { %v1429_v6 = vmax.f32 %v1424_v62, 0.0  ;;  %v1550_v7 = vmax.f32 %v1545_v0, 0.0  ;;  %v2097_v8 = vpop.f32.mrb[35].mxu0  ;;  %v2123_v9 = vpop.f32.mrb[27].mxu1 }
 0x739   : > { %v1430_v10 = vadd.f32 %v1429_v6, %v2495_v63  ;;  %v1551_v11 = vadd.f32 %v1550_v7, %v2529_v15 }
 0x73b   : > { %v2213_v61 = vpop.eup %2212  ;;  %v1431_v60 = vpack.c.bf16 %v1430_v10, %v1430_v10  ;;  %v1552_v12 = vpack.c.bf16 %v1551_v11, %v1551_v11 }
 0x73c   : > { %v2215_v13 = vpop.eup %2214  ;;  %v1231_v14 = vadd.f32 1.0, %v2213_v61 }
 0x73d   : > { %v1352_v16 = vadd.f32 1.0, %v2215_v13  ;;  %2113 = vmatmul.mubr.msk.bf16.vlgmr.msra.gmra.mrb[36].mxu0 %vm527_vm3, %v1431_v60  ;;  %2139 = vmatmul.mubr.msk.bf16.vlgmr.msra.gmra.mrb[28].mxu1 %vm527_vm3, %v1552_v12 }
 0x73e   : > { %2216 = vrcp.f32 %v1231_v14 }
 0x73f   : > { %2218 = vrcp.f32 %v1352_v16 }
 0x748   : > { %v2217_v17 = vpop.eup %2216 }
 0x749   : > { %v2219_v18 = vpop.eup %2218  ;;  %1234 = vst.msk [vmem:[%s2587_s12] sm:$0xff] %vm367_vm1, %v2217_v17 }
 0x74a   : > { %1356 = vrot.lane.b32.xlu1 %v2219_v18, %s2238_s17 }
 0x7bc   : > { %v1357_v63 = vpop.permute.xlu1 %1356 }
 0x7bd   : > { %1360 = vst.msk [vmem:[%s2587_s12] sm:$0xff] %vm1359_vm11, %v1357_v63 }
 0x810   : > { %v1469_v15 = vpop.f32.mrb[36].mxu0  ;;  %v1590_v19 = vpop.f32.mrb[28].mxu1 }
 0x811   : > { %v1470_v20 = vadd.f32 %v1469_v15, %v314_v43  ;;  %v1591_v21 = vadd.f32 %v1590_v19, %v314_v43  ;;  %v2114_v22 = vpop.f32.mrb[37].mxu0  ;;  %v2140_v23 = vpop.f32.mrb[29].mxu1 }
 0x812   : > { %v1472_v24 = vpop.f32.mrb[38].mxu0  ;;  %v1593_v25 = vpop.f32.mrb[30].mxu1 }
 0x813   : > { %v1791_v26 = vmul.f32 -1.442695, %v1470_v20  ;;  %v1800_v27 = vmul.f32 -1.442695, %v1591_v21  ;;  %v2115_v28 = vpop.f32.mrb[39].mxu0  ;;  %v2141_v29 = vpop.f32.mrb[31].mxu1 }
 0x815   : > { %2220 = vpow2.f32 %v1791_v26 }
 0x816   : > { %2222 = vpow2.f32 %v1800_v27 }
 0x81f   : > { %v2221_v30 = vpop.eup %2220 }
 0x820   : > { %v2223_v32 = vpop.eup %2222  ;;  %v1478_v33 = vadd.f32 1.0, %v2221_v30 }
 0x821   : > { %v1599_v34 = vadd.f32 1.0, %v2223_v32 }
 0x822   : > { %2224 = vrcp.f32 %v1478_v33 }
 0x823   : > { %2226 = vrcp.f32 %v1599_v34 }
 0x82c   : > { %v2225_v35 = vpop.eup %2224 }
 0x82d   : > { %v2227_v37 = vpop.eup %2226  ;;  %1481 = vst.msk [vmem:[%s2587_s12 + $0x8] sm:$0xff] %vm367_vm1, %v2225_v35 }
 0x82e   : > { %1603 = vrot.lane.b32.xlu0 %v2227_v37, %s2238_s17 }
 0x8a0   : > { %v1604_v38 = vpop.permute.xlu0 %1603 }
 0x8a1   : > { %1606 = vst.msk [vmem:[%s2587_s12 + $0x8] sm:$0xff] %vm1359_vm11, %v1604_v38 }
 0x8a2 PF: > { %s18_s27 = sadd.s32 1, %s2234_s27  }
 0x8a3   : > { %p15_p4 = scmp.ge.s32.totalorder %s18_s27, 4  }
 0x8a5   :  { %17 = sbr.rel (!%p15_p4) target bundleno = 1 (0x1), region = 88 }

</bundles_post_ra>
